<compile_context>
chip_gen: v6e
topology: v6e:2x2x1
jax: 0.10.0
libtpu: 0.0.40
codegen_flags: <defaults>
</compile_context>

<pallas_src>
import jax
import jax.numpy as jnp
from jax.experimental import pallas as pl
from jax.experimental.pallas import tpu as pltpu

LANE = 128          # MXU / lane width
BF16_SUBLANE = 16   # bf16 packs two rows per sublane


def _round_up(n, m):
    return ((n + m - 1) // m) * m


def _classifier_head_kernel(x_ref, w1_ref, b1_ref, w2_ref, b2_ref,
                            w3_ref, b3_ref, o_ref):
    # Layer 1: bf16 MXU operands, f32 accumulation; bias + ReLU epilogue in f32.
    h1 = jnp.dot(x_ref[...], w1_ref[...], preferred_element_type=jnp.float32)
    h1 = jnp.maximum(h1 + b1_ref[...], 0.0)
    # Layer 2.
    h2 = jnp.dot(h1.astype(w2_ref.dtype), w2_ref[...],
                 preferred_element_type=jnp.float32)
    h2 = jnp.maximum(h2 + b2_ref[...], 0.0)
    # Layer 3: logits (no activation).
    out = jnp.dot(h2.astype(w3_ref.dtype), w3_ref[...],
                  preferred_element_type=jnp.float32)
    o_ref[...] = (out + b3_ref[...]).astype(o_ref.dtype)


def _pad2(a, rows, cols, dtype):
    return jnp.zeros((rows, cols), dtype).at[:a.shape[0], :a.shape[1]].set(
        a.astype(dtype))


def _tpu_vmem_capacity():
    # Capability query only; affects tile sizing, never kernel semantics.
    try:
        return int(pltpu.get_tpu_info().vmem_capacity_bytes)
    except Exception:
        return 64 << 20  # conservative default (v7x per-TC VMEM)


def prepare_params(w1, b1, w2, b2, w3, b3, *, compute_dtype=jnp.bfloat16):
    """Pad feature dims to multiples of 128 and cast weights to bf16 ONCE.

    Hoisted out of the per-call path (perf review): call this at init and reuse
    the returned (padded_params, meta) for every classifier_head() call.
    Weights are (in, out) = transpose of PyTorch's nn.Linear weight.
    Zero padding preserves semantics: padded x columns hit zero w1 rows, padded
    hidden columns get zero bias -> ReLU(0)=0 -> hit zero rows of the next
    weight; padded batch rows / class columns are sliced off by the wrapper.
    """
    D_in, H = w1.shape
    H2, C = w2.shape[1], w3.shape[1]
    Dp, Hp, H2p, Cp = (_round_up(d, LANE) for d in (D_in, H, H2, C))
    f32 = jnp.float32
    padded = (
        _pad2(w1, Dp, Hp, compute_dtype),
        _pad2(jnp.reshape(b1, (1, -1)), 1, Hp, f32),
        _pad2(w2, Hp, H2p, compute_dtype),
        _pad2(jnp.reshape(b2, (1, -1)), 1, H2p, f32),
        _pad2(w3, H2p, Cp, compute_dtype),
        _pad2(jnp.reshape(b3, (1, -1)), 1, Cp, f32),
    )
    meta = dict(D_in=D_in, C=C, Dp=Dp, Hp=Hp, H2p=H2p, Cp=Cp,
                compute_dtype=compute_dtype)
    return padded, meta


def _pick_batch_tile(B, max_blk, two_tc):
    """MXU-aligned batch tile minimizing padded waste; keep >=2 grid steps when
    two TensorCores are available and there is more than one lane-width of
    batch. Tiny batches use a bf16-sublane-aligned (multiple of 16) tile."""
    if B <= LANE:
        blk = _round_up(max(B, 1), BF16_SUBLANE)
        return blk, blk
    best = None
    for cand in range(LANE, max_blk + 1, LANE):
        bp = _round_up(B, cand)
        steps = bp // cand
        if two_tc and steps < 2:
            continue  # keep both v7x TensorCores busy
        key = (bp - B, -cand)  # least padding waste first, then largest tile
        if best is None or key < best[1]:
            best = ((cand, bp), key)
    if best is None:  # defensive: split in two MXU-aligned tiles
        cand = max(LANE, _round_up(_round_up(B, 2) // 2, LANE))
        return cand, _round_up(B, cand)
    return best[0]


def classifier_head(x, padded_params, meta, *, block_b=None, out_dtype=None):
    """Fused 3-layer MLP head. Returns (B, num_classes) in out_dtype (def: x.dtype)."""
    B, D_in = x.shape
    assert D_in == meta["D_in"], "input dim mismatch with prepared params"
    out_dtype = out_dtype or x.dtype
    Dp, Hp, H2p, Cp = meta["Dp"], meta["Hp"], meta["H2p"], meta["Cp"]
    compute_dtype = meta["compute_dtype"]

    vmem_cap = _tpu_vmem_capacity()
    two_tc = vmem_cap <= (64 << 20)             # v7x: 64 MiB VMEM, 2 TCs/chip
    if block_b is None:
        block_b = 512 if vmem_cap >= (96 << 20) else 256   # v5e/v6e vs v7x

    blk, Bp = _pick_batch_tile(B, block_b, two_tc)

    # Tight VMEM accounting (perf review): weights resident once, x/out
    # double-buffered tiles, f32 + bf16 intermediates, ~2 MiB Mosaic headroom.
    weight_bytes = sum(int(a.size) * a.dtype.itemsize for a in padded_params)
    c_item = jnp.dtype(compute_dtype).itemsize
    o_item = jnp.dtype(out_dtype).itemsize

    def footprint(blk_):
        return (weight_bytes
                + 2 * blk_ * Dp * c_item              # x double buffer
                + 2 * blk_ * Cp * o_item              # out double buffer
                + blk_ * (Hp + H2p) * (4 + c_item)    # f32 + bf16 intermediates
                + (2 << 20))                          # scratch headroom

    # Shrink the batch tile if it would not fit this generation's VMEM.
    while footprint(blk) > vmem_cap and blk > BF16_SUBLANE:
        blk = max(BF16_SUBLANE, _round_up(blk // 2, BF16_SUBLANE))
        Bp = _round_up(B, blk)
    # TODO(synk): for very large heads (bf16 weight bytes approaching the VMEM
    # cap, e.g. huge num_classes on v7x's 64 MiB) add a class-blocked grid axis
    # for layer 3 instead of keeping all weights VMEM-resident.

    vmem_limit = int(min(max(footprint(blk), 16 << 20), vmem_cap))

    # Only x is padded per call (weights were padded once in prepare_params).
    xp = _pad2(x, Bp, Dp, compute_dtype)

    flops = int(2 * Bp * (Dp * Hp + Hp * H2p + H2p * Cp))
    bytes_accessed = int(Bp * Dp * c_item + weight_bytes + Bp * Cp * o_item)

    # Whole-array VMEM-resident spec for grid-invariant weights/biases:
    # copied into VMEM once, never re-DMA'd or double-buffered per grid step.
    resident = pl.BlockSpec(memory_space=pltpu.MemorySpace.VMEM)

    out_p = pl.pallas_call(
        _classifier_head_kernel,
        out_shape=jax.ShapeDtypeStruct((Bp, Cp), out_dtype),
        grid_spec=pltpu.PrefetchScalarGridSpec(
            num_scalar_prefetch=0,
            grid=(Bp // blk,),
            in_specs=[
                pl.BlockSpec((blk, Dp), lambda i: (i, 0)),  # streamed x tile
                resident, resident,   # w1, b1
                resident, resident,   # w2, b2
                resident, resident,   # w3, b3
            ],
            out_specs=pl.BlockSpec((blk, Cp), lambda i: (i, 0)),
        ),
        compiler_params=pltpu.CompilerParams(
            dimension_semantics=("parallel",),
            vmem_limit_bytes=vmem_limit),
        cost_estimate=pl.CostEstimate(
            flops=flops, transcendentals=0, bytes_accessed=bytes_accessed),
    )(xp, *padded_params)

    return out_p[:B, :meta["C"]]


def init_params(key, input_dim, hidden_dim, num_classes, dtype=jnp.float32):
    """Deterministic synthetic params; shapes mirror the nn.Linear stack."""
    h2 = hidden_dim // 2
    ks = jax.random.split(key, 6)
    # Stored as (in, out) = transpose of PyTorch's (out, in) Linear weight.
    w1 = jax.random.normal(ks[0], (input_dim, hidden_dim), dtype) * 0.1
    b1 = jax.random.normal(ks[1], (1, hidden_dim), dtype) * 0.1
    w2 = jax.random.normal(ks[2], (hidden_dim, h2), dtype) * 0.1
    b2 = jax.random.normal(ks[3], (1, h2), dtype) * 0.1
    w3 = jax.random.normal(ks[4], (h2, num_classes), dtype) * 0.1
    b3 = jax.random.normal(ks[5], (1, num_classes), dtype) * 0.1
    return w1, b1, w2, b2, w3, b3


def reference_f32(x, w1, b1, w2, b2, w3, b3):
    h1 = jnp.maximum(x @ w1 + b1, 0.0)
    h2 = jnp.maximum(h1 @ w2 + b2, 0.0)
    return h2 @ w3 + b3


def reference_bf16(x, w1, b1, w2, b2, w3, b3):
    """Emulates the kernel's numerics: bf16 MXU operands, f32 accumulation."""
    bf = lambda a: a.astype(jnp.bfloat16).astype(jnp.float32)
    h1 = jnp.maximum(jnp.dot(bf(x), bf(w1)) + b1, 0.0)
    h2 = jnp.maximum(jnp.dot(bf(h1), bf(w2)) + b2, 0.0)
    return jnp.dot(bf(h2), bf(w3)) + b3


if __name__ == "__main__":
    key = jax.random.PRNGKey(0)
    k_x, k_p = jax.random.split(key)

    batch, input_dim, hidden_dim, num_classes = 8, 32, 32, 8
    x = jax.random.normal(k_x, (batch, input_dim), jnp.float32)
    raw_params = init_params(k_p, input_dim, hidden_dim, num_classes)

    # Pad/cast weights ONCE (hoisted out of the per-call path), then call.
    padded_params, meta = prepare_params(*raw_params)
    out = classifier_head(x, padded_params, meta)
    out = jax.block_until_ready(out)

    assert out.shape == (batch, num_classes)
    # Tight check vs. bf16-operand / f32-accumulate reference (kernel numerics).
    ref_bf = reference_bf16(x, *raw_params)
    assert jnp.allclose(out, ref_bf, atol=1e-3, rtol=1e-3)
    # Loose check vs. the pure-f32 PyTorch-equivalent forward.
    ref = reference_f32(x, *raw_params)
    assert jnp.allclose(out, ref, atol=3e-2, rtol=3e-2)

    print("KERNEL_OK")
</pallas_src>

<mosaic_0001>
module attributes {stable_mosaic.version = 11 : i64} {
  func.func @_classifier_head_kernel(%arg0: i32, %arg1: memref<16x128xbf16, #tpu.memory_space<vmem>>, %arg2: memref<128x128xbf16, #tpu.memory_space<vmem>>, %arg3: memref<1x128xf32, #tpu.memory_space<vmem>>, %arg4: memref<128x128xbf16, #tpu.memory_space<vmem>>, %arg5: memref<1x128xf32, #tpu.memory_space<vmem>>, %arg6: memref<128x128xbf16, #tpu.memory_space<vmem>>, %arg7: memref<1x128xf32, #tpu.memory_space<vmem>>, %arg8: memref<16x128xf32, #tpu.memory_space<vmem>>) attributes {dimension_semantics = [#tpu.dimension_semantics<parallel>], iteration_bounds = array<i64: 1>, scalar_prefetch = 0 : i64, scratch_operands = 0 : i64, tpu.core_type = #tpu.core_type<tc>, window_params = [{transform_indices = @transform_0, window_bounds = array<i64: 16, 128>}, {pipeline_mode = #tpu.pipeline_mode<synchronous>, transform_indices = @transform_1, window_bounds = array<i64: 128, 128>}, {pipeline_mode = #tpu.pipeline_mode<synchronous>, transform_indices = @transform_2, window_bounds = array<i64: 1, 128>}, {pipeline_mode = #tpu.pipeline_mode<synchronous>, transform_indices = @transform_3, window_bounds = array<i64: 128, 128>}, {pipeline_mode = #tpu.pipeline_mode<synchronous>, transform_indices = @transform_4, window_bounds = array<i64: 1, 128>}, {pipeline_mode = #tpu.pipeline_mode<synchronous>, transform_indices = @transform_5, window_bounds = array<i64: 128, 128>}, {pipeline_mode = #tpu.pipeline_mode<synchronous>, transform_indices = @transform_6, window_bounds = array<i64: 1, 128>}, {transform_indices = @transform_7, window_bounds = array<i64: 16, 128>}]} {
    %c0 = arith.constant 0 : index
    %c0_0 = arith.constant 0 : index
    %0 = vector.load %arg1[%c0, %c0_0] : memref<16x128xbf16, #tpu.memory_space<vmem>>, vector<16x128xbf16>
    %c0_1 = arith.constant 0 : index
    %c0_2 = arith.constant 0 : index
    %1 = vector.load %arg2[%c0_1, %c0_2] : memref<128x128xbf16, #tpu.memory_space<vmem>>, vector<128x128xbf16>
    %cst = arith.constant dense<0.000000e+00> : vector<16x128xf32>
    %2 = tpu.matmul %0, %1, %cst {dimension_numbers = #tpu.dot_dimension_numbers<[1], [0], [0], [1], [0, 0, 1, 1], [], []>} : vector<16x128xbf16>, vector<128x128xbf16>, vector<16x128xf32> -> vector<16x128xf32>
    %c0_3 = arith.constant 0 : index
    %c0_4 = arith.constant 0 : index
    %3 = vector.load %arg3[%c0_3, %c0_4] : memref<1x128xf32, #tpu.memory_space<vmem>>, vector<1x128xf32>
    %4 = vector.broadcast %3 : vector<1x128xf32> to vector<16x128xf32>
    %5 = arith.addf %2, %4 : vector<16x128xf32>
    %cst_5 = arith.constant 0.000000e+00 : f32
    %6 = vector.broadcast %cst_5 : f32 to vector<16x128xf32>
    %7 = arith.maximumf %5, %6 : vector<16x128xf32>
    %8 = arith.truncf %7 : vector<16x128xf32> to vector<16x128xbf16>
    %c0_6 = arith.constant 0 : index
    %c0_7 = arith.constant 0 : index
    %9 = vector.load %arg4[%c0_6, %c0_7] : memref<128x128xbf16, #tpu.memory_space<vmem>>, vector<128x128xbf16>
    %cst_8 = arith.constant dense<0.000000e+00> : vector<16x128xf32>
    %10 = tpu.matmul %8, %9, %cst_8 {dimension_numbers = #tpu.dot_dimension_numbers<[1], [0], [0], [1], [0, 0, 1, 1], [], []>} : vector<16x128xbf16>, vector<128x128xbf16>, vector<16x128xf32> -> vector<16x128xf32>
    %c0_9 = arith.constant 0 : index
    %c0_10 = arith.constant 0 : index
    %11 = vector.load %arg5[%c0_9, %c0_10] : memref<1x128xf32, #tpu.memory_space<vmem>>, vector<1x128xf32>
    %12 = vector.broadcast %11 : vector<1x128xf32> to vector<16x128xf32>
    %13 = arith.addf %10, %12 : vector<16x128xf32>
    %cst_11 = arith.constant 0.000000e+00 : f32
    %14 = vector.broadcast %cst_11 : f32 to vector<16x128xf32>
    %15 = arith.maximumf %13, %14 : vector<16x128xf32>
    %16 = arith.truncf %15 : vector<16x128xf32> to vector<16x128xbf16>
    %c0_12 = arith.constant 0 : index
    %c0_13 = arith.constant 0 : index
    %17 = vector.load %arg6[%c0_12, %c0_13] : memref<128x128xbf16, #tpu.memory_space<vmem>>, vector<128x128xbf16>
    %cst_14 = arith.constant dense<0.000000e+00> : vector<16x128xf32>
    %18 = tpu.matmul %16, %17, %cst_14 {dimension_numbers = #tpu.dot_dimension_numbers<[1], [0], [0], [1], [0, 0, 1, 1], [], []>} : vector<16x128xbf16>, vector<128x128xbf16>, vector<16x128xf32> -> vector<16x128xf32>
    %c0_15 = arith.constant 0 : index
    %c0_16 = arith.constant 0 : index
    %19 = vector.load %arg7[%c0_15, %c0_16] : memref<1x128xf32, #tpu.memory_space<vmem>>, vector<1x128xf32>
    %20 = vector.broadcast %19 : vector<1x128xf32> to vector<16x128xf32>
    %21 = arith.addf %18, %20 : vector<16x128xf32>
    %c0_17 = arith.constant 0 : index
    %c0_18 = arith.constant 0 : index
    %22 = vector.load %arg8[%c0_17, %c0_18] : memref<16x128xf32, #tpu.memory_space<vmem>>, vector<16x128xf32>
    tpu.vector_store %arg8[%c0_17, %c0_18], %21 {strides = array<i32>} : memref<16x128xf32, #tpu.memory_space<vmem>>, vector<16x128xf32>,
    return
  }
  func.func @transform_0(%arg0: i32) -> (i32, i32) {
    %c0_i32 = arith.constant 0 : i32
    %c0_i32_0 = arith.constant 0 : i32
    return %arg0, %c0_i32 : i32, i32
  }
  func.func @transform_1(%arg0: i32) -> (i32, i32) {
    %c0_i32 = arith.constant 0 : i32
    %c0_i32_0 = arith.constant 0 : i32
    %c0_i32_1 = arith.constant 0 : i32
    return %c0_i32, %c0_i32_0 : i32, i32
  }
  func.func @transform_2(%arg0: i32) -> (i32, i32) {
    %c0_i32 = arith.constant 0 : i32
    %c0_i32_0 = arith.constant 0 : i32
    %c0_i32_1 = arith.constant 0 : i32
    return %c0_i32, %c0_i32_0 : i32, i32
  }
  func.func @transform_3(%arg0: i32) -> (i32, i32) {
    %c0_i32 = arith.constant 0 : i32
    %c0_i32_0 = arith.constant 0 : i32
    %c0_i32_1 = arith.constant 0 : i32
    return %c0_i32, %c0_i32_0 : i32, i32
  }
  func.func @transform_4(%arg0: i32) -> (i32, i32) {
    %c0_i32 = arith.constant 0 : i32
    %c0_i32_0 = arith.constant 0 : i32
    %c0_i32_1 = arith.constant 0 : i32
    return %c0_i32, %c0_i32_0 : i32, i32
  }
  func.func @transform_5(%arg0: i32) -> (i32, i32) {
    %c0_i32 = arith.constant 0 : i32
    %c0_i32_0 = arith.constant 0 : i32
    %c0_i32_1 = arith.constant 0 : i32
    return %c0_i32, %c0_i32_0 : i32, i32
  }
  func.func @transform_6(%arg0: i32) -> (i32, i32) {
    %c0_i32 = arith.constant 0 : i32
    %c0_i32_0 = arith.constant 0 : i32
    %c0_i32_1 = arith.constant 0 : i32
    return %c0_i32, %c0_i32_0 : i32, i32
  }
  func.func @transform_7(%arg0: i32) -> (i32, i32) {
    %c0_i32 = arith.constant 0 : i32
    %c0_i32_0 = arith.constant 0 : i32
    return %arg0, %c0_i32 : i32, i32
  }
}

</mosaic_0001>

<bundles_post_ra>
// kernel: tpu_custom_call.1
= control target key start
LH: loop header
LB: loop body
LE: loop exit
PB: predicated region body
PF: predicated region fallthrough
CT: control target
= control target key end

     0   :  { %12 = vsyncpa [#allocation3], 0  ;;  %s830_s0 = inlined_call_operand.hbm [shape: bf16[16,128], index: 0, kind: input, shape index: {}]   ;;  %s831_s1 = inlined_call_operand.hbm [shape: bf16[128,128], index: 1, kind: input, shape index: {}]   ;;  %s832_s2 = inlined_call_operand.vmem [shape: f32[1,128], index: 2, kind: input, shape index: {}]   ;;  %s833_s3 = inlined_call_operand.hbm [shape: bf16[128,128], index: 3, kind: input, shape index: {}]   ;;  %s834_s4 = inlined_call_operand.vmem [shape: f32[1,128], index: 4, kind: input, shape index: {}]   ;;  %s835_s5 = inlined_call_operand.hbm [shape: bf16[128,128], index: 5, kind: input, shape index: {}]   ;;  %s836_s6 = inlined_call_operand.vmem [shape: f32[1,128], index: 6, kind: input, shape index: {}]   ;;  %s837_s7 = inlined_call_operand.hbm [shape: f32[16,128], index: 7, kind: output, shape index: {}]  }
   0x1   :  { %13 = vsyncpa [#allocation6], 0 }
   0x2   :  { %14 = vsyncpa [#allocation9], 0 }
   0x3   :  { %15 = vsyncpa [#allocation4], 0  ;;  %s713_s24 = smov [#allocation5]   ;;  %s714_s26 = smov [#allocation2]  }
   0x4   :  { %s33_s25 = sshll.u32 %s713_s24, 4  ;;  %s21_s27 = sshll.u32 %s714_s26, 4  ;;  %s34_s25 = int_to_ptr.vmem [resolvable:$true] %s33_s25  ;;  %s22_s27 = int_to_ptr.vmem [resolvable:$true] %s21_s27 }
   0x5   :  { %s613_s28 = scalar_lea.vmem %s34_s25, 1024  ;;  %p618_p1 = scmp.lt.s32.totalorder %s34_s25, %s34_s25 }
   0x6   :  { %p614_p0 = scmp.ne.s32.totalorder %s34_s25, %s613_s28  ;;  %p619_p2 = scmp.lt.s32.totalorder %s613_s28, %s613_s28 }
   0x8   :  { %p620_p3 = por %p619_p2, %p618_p1 }
   0xa   :  { %p621_p4 = pnand %p620_p3, %p614_p0 }
   0xc   :  { %624 = shalt.err (!%p621_p4)
}
   0xd   :  { %s715_s29 = smov 64   ;;  %s716_s30 = smov 4  }
   0xe   :  { %39 = dma.hbm_to_vmem [thread:$0]  %s831_s1, 1024, %s34_s25, [#allocation6], %s715_s29, %s715_s29, %s716_s30  }
   0xf   :  { %s633_s10 = scalar_lea.vmem %s22_s27, 128  ;;  %p638_p6 = scmp.lt.s32.totalorder %s22_s27, %s22_s27 }
  0x10   :  { %p634_p5 = scmp.ne.s32.totalorder %s22_s27, %s633_s10  ;;  %p639_p7 = scmp.lt.s32.totalorder %s633_s10, %s633_s10 }
  0x12   :  { %p640_p8 = por %p639_p7, %p638_p6 }
  0x14   :  { %p641_p9 = pnand %p640_p8, %p634_p5 }
  0x16   :  { %644 = shalt.err (!%p641_p9)
}
  0x17   :  { %27 = dma.hbm_to_vmem [thread:$0]  %s830_s0, 128, %s22_s27, [#allocation3], %s715_s29, %s715_s29, %s716_s30  }
  0x18   :  { %s717_s13 = smov [#allocation7]   ;;  %s718_s15 = smov [#allocation8]  }
  0x19   :  { %s47_s14 = sshll.u32 %s717_s13, 4  ;;  %s61_s16 = sshll.u32 %s718_s15, 4  ;;  %s48_s14 = int_to_ptr.vmem [resolvable:$true] %s47_s14  ;;  %s62_s16 = int_to_ptr.vmem [resolvable:$true] %s61_s16 }
  0x1a   :  { %s653_s1 = scalar_lea.vmem %s48_s14, 1024  ;;  %p658_p11 = scmp.lt.s32.totalorder %s48_s14, %s48_s14 }
  0x1b   :  { %p654_p10 = scmp.ne.s32.totalorder %s48_s14, %s653_s1  ;;  %p659_p12 = scmp.lt.s32.totalorder %s653_s1, %s653_s1 }
  0x1d   :  { %p660_p13 = por %p659_p12, %p658_p11 }
  0x1f   :  { %p661_p0 = pnand %p660_p13, %p654_p10 }
  0x21   :  { %664 = shalt.err (!%p661_p0)
}
  0x22   :  { %53 = dma.hbm_to_vmem [thread:$0]  %s833_s3, 1024, %s48_s14, [#allocation6], %s715_s29, %s715_s29, %s716_s30  }
  0x23   :  { %s673_s0 = scalar_lea.vmem %s62_s16, 1024  ;;  %p678_p2 = scmp.lt.s32.totalorder %s62_s16, %s62_s16 }
  0x24   :  { %p674_p1 = scmp.ne.s32.totalorder %s62_s16, %s673_s0  ;;  %p679_p3 = scmp.lt.s32.totalorder %s673_s0, %s673_s0 }
  0x26   :  { %p680_p4 = por %p679_p3, %p678_p2 }
  0x28   :  { %p681_p5 = pnand %p680_p4, %p674_p1 }
  0x2a   :  { %684 = shalt.err (!%p681_p5)
}
  0x2b   :  { %67 = dma.hbm_to_vmem [thread:$0]  %s835_s5, 1024, %s62_s16, [#allocation9], %s715_s29, %s715_s29, %s716_s30  }
  0x2c   :  { %705 = dma.done.wait [#allocation3], 128  }
  0x2d   :  { %706 = vsyncadd [#allocation3], 4294967168 }
  0x2e   :  { %707 = dma.done.wait [#allocation6], 2048  }
  0x2f   :  { %708 = vsyncadd [#allocation6], 4294965248 }
  0x30   :  { %709 = dma.done.wait [#allocation9], 1024  }
  0x31   :  { %710 = vsyncadd [#allocation9], 4294966272  ;;  %v719_v0 = vmov 0.0   ;;  %vm720_vm0 = vmmov 0   ;;  %v580_v1 = vld [vmem:[#allocation5 + $0x38] sm:$0xff]   ;;  %v581_v2 = vld [vmem:[#allocation5 + $0x30] sm:$0xff]  }
  0x32   :  { %509 = vmatprep.subr.bf16.mxu0 %v719_v0  ;;  %525 = vmatprep.mubr.msk.bf16.mxu0 %vm720_vm0, %v719_v0  ;;  %v582_v3 = vld [vmem:[#allocation5 + $0x28] sm:$0xff]   ;;  %v589_v4 = vld [vmem:[#allocation7 + $0x38] sm:$0xff]   ;;  %v583_v5 = vld [vmem:[#allocation5 + $0x20] sm:$0xff]   ;;  %s721_s24 = smov [#allocation10]  }
  0x33   :  { %529 = vmatprep.subr.bf16.mxu1 %v719_v0  ;;  %545 = vmatprep.mubr.msk.bf16.mxu1 %vm720_vm0, %v719_v0  ;;  %v590_v6 = vld [vmem:[#allocation7 + $0x30] sm:$0xff]   ;;  %v584_v7 = vld [vmem:[#allocation5 + $0x18] sm:$0xff]   ;;  %v591_v8 = vld [vmem:[#allocation7 + $0x28] sm:$0xff]   ;;  %s440_s25 = sshll.u32 %s721_s24, 4  ;;  %s441_s25 = int_to_ptr.vmem [resolvable:$true] %s440_s25 }
  0x34   :  { %510 = vmatpush3.bf16.msra.mxu0 %v580_v1  ;;  %530 = vmatpush3.bf16.msra.mxu1 %v589_v4  ;;  %v585_v9 = vld [vmem:[#allocation5 + $0x10] sm:$0xff]   ;;  %v592_v10 = vld [vmem:[#allocation7 + $0x20] sm:$0xff]   ;;  %v586_v11 = vld [vmem:[#allocation5 + $0x8] sm:$0xff]   ;;  %p690_p7 = scmp.lt.s32.totalorder %s441_s25, %s441_s25 }
  0x35   :  { %511 = vmatprep.subr.bf16.mxu0 %v719_v0  ;;  %531 = vmatprep.subr.bf16.mxu1 %v719_v0  ;;  %v593_v12 = vld [vmem:[#allocation7 + $0x18] sm:$0xff]   ;;  %v587_v13 = vld [vmem:[#allocation5] sm:$0xff]   ;;  %v594_v15 = vld [vmem:[#allocation7 + $0x10] sm:$0xff]  }
  0x36   :  { %v588_v14 = vld [vmem:[#allocation2] sm:$0xff]   ;;  %v595_v16 = vld [vmem:[#allocation7 + $0x8] sm:$0xff]   ;;  %v596_v17 = vld [vmem:[#allocation7] sm:$0xff]  }
  0x37   :  { %v597_v18 = vld [vmem:[#allocation8 + $0x38] sm:$0xff]   ;;  %v598_v19 = vld [vmem:[#allocation8 + $0x30] sm:$0xff]   ;;  %v599_v20 = vld [vmem:[#allocation8 + $0x28] sm:$0xff]  }
  0x38   :  { %512 = vmatpush3.bf16.msra.mxu0 %v581_v2  ;;  %532 = vmatpush3.bf16.msra.mxu1 %v590_v6  ;;  %v600_v21 = vld [vmem:[#allocation8 + $0x20] sm:$0xff]   ;;  %v601_v22 = vld [vmem:[#allocation8 + $0x18] sm:$0xff]   ;;  %v602_v33 = vld [vmem:[#allocation8 + $0x10] sm:$0xff]  }
  0x39   :  { %513 = vmatprep.subr.bf16.mxu0 %v719_v0  ;;  %533 = vmatprep.subr.bf16.mxu1 %v719_v0  ;;  %v454_v23 = vld [vmem:[%s832_s2] ss:$0 sm:$0xff]  ;;  %v603_v34 = vld [vmem:[#allocation8 + $0x8] sm:$0xff]   ;;  %v604_v35 = vld [vmem:[#allocation8] sm:$0xff]  }
  0x3a   :  { %v464_v36 = vld [vmem:[%s834_s4] ss:$0 sm:$0xff]  ;;  %s685_s4 = scalar_lea.vmem %s441_s25, 256 }
  0x3b   :  { %v473_v46 = vld [vmem:[%s836_s6] ss:$0 sm:$0xff]  ;;  %p686_p6 = scmp.ne.s32.totalorder %s441_s25, %s685_s4  ;;  %p691_p8 = scmp.lt.s32.totalorder %s685_s4, %s685_s4 }
  0x3c   :  { %514 = vmatpush3.bf16.msra.mxu0 %v582_v3  ;;  %534 = vmatpush3.bf16.msra.mxu1 %v591_v8 }
  0x3d   :  { %515 = vmatprep.subr.bf16.mxu0 %v719_v0  ;;  %535 = vmatprep.subr.bf16.mxu1 %v719_v0  ;;  %p692_p9 = por %p691_p8, %p690_p7 }
  0x3f   :  { %p693_p10 = pnand %p692_p9, %p686_p6 }
  0x40   :  { %516 = vmatpush3.bf16.msra.mxu0 %v583_v5  ;;  %536 = vmatpush3.bf16.msra.mxu1 %v592_v10 }
  0x41   :  { %517 = vmatprep.subr.bf16.mxu0 %v719_v0  ;;  %537 = vmatprep.subr.bf16.mxu1 %v719_v0 }
  0x44   :  { %518 = vmatpush3.bf16.msra.mxu0 %v584_v7  ;;  %538 = vmatpush3.bf16.msra.mxu1 %v593_v12 }
  0x45   :  { %519 = vmatprep.subr.bf16.mxu0 %v719_v0  ;;  %539 = vmatprep.subr.bf16.mxu1 %v719_v0 }
  0x48   :  { %520 = vmatpush3.bf16.msra.mxu0 %v585_v9  ;;  %540 = vmatpush3.bf16.msra.mxu1 %v594_v15 }
  0x49   :  { %521 = vmatprep.subr.bf16.mxu0 %v719_v0  ;;  %541 = vmatprep.subr.bf16.mxu1 %v719_v0 }
  0x4c   :  { %522 = vmatpush3.bf16.msra.mxu0 %v586_v11  ;;  %542 = vmatpush3.bf16.msra.mxu1 %v595_v16 }
  0x4d   :  { %523 = vmatprep.subr.bf16.mxu0 %v719_v0  ;;  %543 = vmatprep.subr.bf16.mxu1 %v719_v0 }
  0x50   :  { %524 = vmatpush3.bf16.msra.mxu0 %v587_v13  ;;  %544 = vmatpush3.bf16.msra.mxu1 %v596_v17 }
  0x51   :  { %549 = vmatprep.subr.bf16.mxu0 %v719_v0 }
  0x53   :  { %526 = vmatmul.mubr.bf16.vlgmr.msra.gmra.mxu0 %v588_v14 }
  0x54   :  { %565 = vmatprep.mubr.msk.bf16.mxu0 %vm720_vm0, %v719_v0  ;;  %550 = vmatpush3.bf16.msra.mxu0 %v597_v18 }
  0x55   :  { %551 = vmatprep.subr.bf16.mxu0 %v719_v0 }
  0x58   :  { %552 = vmatpush3.bf16.msra.mxu0 %v598_v19 }
  0x59   :  { %553 = vmatprep.subr.bf16.mxu0 %v719_v0 }
  0x5c   :  { %554 = vmatpush3.bf16.msra.mxu0 %v599_v20 }
  0x5d   :  { %555 = vmatprep.subr.bf16.mxu0 %v719_v0 }
  0x60   :  { %556 = vmatpush3.bf16.msra.mxu0 %v600_v21 }
  0x61   :  { %557 = vmatprep.subr.bf16.mxu0 %v719_v0 }
  0x64   :  { %558 = vmatpush3.bf16.msra.mxu0 %v601_v22 }
  0x65   :  { %559 = vmatprep.subr.bf16.mxu0 %v719_v0 }
  0x68   :  { %560 = vmatpush3.bf16.msra.mxu0 %v602_v33 }
  0x69   :  { %561 = vmatprep.subr.bf16.mxu0 %v719_v0 }
  0x6c   :  { %562 = vmatpush3.bf16.msra.mxu0 %v603_v34 }
  0x6d   :  { %563 = vmatprep.subr.bf16.mxu0 %v719_v0 }
  0x70   :  { %564 = vmatpush3.bf16.msra.mxu0 %v604_v35 }
 0x113   :  { %v196_v24 = vpop.f32.mrf.mxu0 }
 0x114   :  { %v197_v26 = vadd.f32 %v454_v23, %v196_v24 }
 0x115   :  { %v527_v25 = vpop.f32.mrf.mxu0 }
 0x116   :  { %v203_v30 = vmax.f32 %v197_v26, 0.0 }
 0x117   :  { %v199_v27 = vpop.f32.mrf.mxu0 }
 0x118   :  { %v200_v28 = vadd.f32 %v454_v23, %v199_v27 }
 0x119   :  { %v528_v29 = vpop.f32.mrf.mxu0 }
 0x11a   :  { %v204_v31 = vmax.f32 %v200_v28, 0.0 }
 0x11c   :  { %v205_v32 = vpack.c.bf16 %v204_v31, %v203_v30 }
 0x11e   :  { %546 = vmatmul.mubr.bf16.vlgmr.msra.gmra.mxu1 %v205_v32 }
 0x1de   :  { %v311_v37 = vpop.f32.mrf.mxu1 }
 0x1df   :  { %v312_v39 = vadd.f32 %v464_v36, %v311_v37 }
 0x1e0   :  { %v547_v38 = vpop.f32.mrf.mxu1 }
 0x1e1   :  { %v318_v43 = vmax.f32 %v312_v39, 0.0 }
 0x1e2   :  { %v314_v40 = vpop.f32.mrf.mxu1 }
 0x1e3   :  { %v315_v41 = vadd.f32 %v464_v36, %v314_v40 }
 0x1e4   :  { %v548_v42 = vpop.f32.mrf.mxu1 }
 0x1e5   :  { %v319_v44 = vmax.f32 %v315_v41, 0.0 }
 0x1e7   :  { %v320_v45 = vpack.c.bf16 %v319_v44, %v318_v43 }
 0x1e9   :  { %566 = vmatmul.mubr.bf16.vlgmr.msra.gmra.mxu0 %v320_v45 }
 0x2a9   :  { %v426_v47 = vpop.f32.mrf.mxu0 }
 0x2aa   :  { %v427_v48 = vadd.f32 %v473_v46, %v426_v47 }
 0x2ab   :  { %v567_v49 = vpop.f32.mrf.mxu0 }
 0x2ac   :  { %433 = vst [vmem:[#allocation10] sm:$0xff] %v427_v48 }
 0x2ad   :  { %v429_v50 = vpop.f32.mrf.mxu0 }
 0x2ae   :  { %v430_v51 = vadd.f32 %v473_v46, %v429_v50 }
 0x2af   :  { %v568_v52 = vpop.f32.mrf.mxu0 }
 0x2b0   :  { %434 = vst [vmem:[#allocation10 + $0x8] sm:$0xff] %v430_v51 }
 0x2b1   :  { %696 = shalt.err (!%p693_p10)
}
 0x2b2   :  { %s722_s26 = smov 128   ;;  %s723_s6 = smov 8  }
 0x2b3   :  { %446 = dma.vmem_to_hbm [thread:$0]  %s441_s25, 256, %s837_s7, [#allocation4], %s722_s26, %s722_s26, %s723_s6  }
 0x2b4   :  { %711 = dma.done.wait [#allocation4], 256  }
 0x2b5   :  { %712 = vsyncadd [#allocation4], 4294967040 }
 0x2b6   :  { %450 = vsyncpa [#allocation3], 1 }
 0x2b7   :  { %451 = vsyncpa [#allocation6], 1 }
 0x2b8   :  { %452 = vsyncpa [#allocation9], 1 }
 0x2b9   :  { %453 = vsyncpa [#allocation4], 1 }

</bundles_post_ra>
